<compile_context>
chip_gen: v7x
topology: tpu7x:2x2x1
jax: 0.10.0
libtpu: 0.0.40
codegen_flags: <defaults>
</compile_context>

<pallas_src>
import functools

import jax
import jax.numpy as jnp
from jax import lax
from jax.experimental import pallas as pl
from jax.experimental.pallas import tpu as pltpu


def _sdpa_kernel(q_ref, k_ref, v_ref, bias_ref, out_ref, *attn_refs,
                 inv_temperature):
    # q_ref:    (1, TQ, D)   k_ref/v_ref: (1, S, D)   bias_ref: (1, 1, S) f32
    # out_ref:  (1, TQ, D)   attn_refs:   () or ((1, TQ, S),)
    q = q_ref[0] * jnp.asarray(inv_temperature, q_ref.dtype)   # (TQ, D)
    k = k_ref[0]                                               # (S, D)
    v = v_ref[0]                                               # (S, D)
    bias = bias_ref[0]                                         # (1, S) f32

    # scores = (Q/temp) @ K^T -> (TQ, S); contract last dims of both operands
    # so no explicit K transpose / VMEM copy is materialized.
    scores = lax.dot_general(
        q, k, (((1,), (1,)), ((), ())), preferred_element_type=jnp.float32
    )
    # masked_fill_(mask, -inf) applied as a precomputed additive finite bias
    # (-1e30), broadcast over query rows.  Fully-masked rows therefore give a
    # uniform 1/S attention row instead of NaN (documented divergence).
    scores = scores + bias

    # Numerically-stable softmax over keys.  Exact normalization: the
    # reciprocal is only computed on the (TQ, 1) denominator, so using the
    # full-precision divide costs nothing and keeps f32 tolerances.
    s_max = jnp.max(scores, axis=-1, keepdims=True)
    p = jnp.exp(scores - s_max)                               # (TQ, S) f32
    inv_denom = 1.0 / jnp.sum(p, axis=-1, keepdims=True)      # (TQ, 1) exact

    if attn_refs:
        # Materialize normalized attention weights; cast once and reuse the
        # casted copy for both the HBM write and the attn @ V matmul.
        (attn_ref,) = attn_refs
        pn = p * inv_denom                                    # (TQ, S) f32
        pn_lo = pn.astype(v.dtype)
        attn_ref[0] = pn_lo if attn_ref.dtype == v.dtype else pn.astype(attn_ref.dtype)
        out = jnp.dot(pn_lo, v, preferred_element_type=jnp.float32)
    else:
        # Flash-style: skip the S*S writeback and defer normalization past
        # the matmul (saves a TQ*S VPU multiply).
        out = jnp.dot(p.astype(v.dtype), v, preferred_element_type=jnp.float32)
        out = out * inv_denom

    out_ref[0] = out.astype(out_ref.dtype)


def _pick_q_tile(s):
    """MXU-friendly query tile; queries are padded instead of odd divisors."""
    if s <= 256:
        return s            # single tile; full-dim block is always legal
    if s % 256 == 0:
        return 256          # v6e/v7x MXU tile is 256x256
    return 128              # pad query axis up to a multiple of 128


def _vmem_limit_bytes(tq, s, d, dtype, return_attn):
    """Scoped-VMEM request derived from the actual double-buffered blocks."""
    item = jnp.dtype(dtype).itemsize
    buffered = 2 * (tq * d * item        # q block
                    + 2 * s * d * item   # resident k + v blocks
                    + s * 4              # f32 bias block
                    + tq * d * item)     # out block
    if return_attn:
        buffered += 2 * tq * s * item    # attn block
    temps = 4 * tq * s * 4               # f32 scores / exp / normalized copies
    total = buffered + temps + (2 << 20)
    # Clamp: >= 32 MiB (cheap everywhere), <= 128 MiB (v5e/v6e physical).
    # Long-S f32 on v7x (64 MiB physical) needs the flash K-tiling TODO.
    return int(min(max(total, 32 << 20), 128 << 20))


def scaled_dot_product_attention(query, key, value, mask=None, *,
                                 temperature, return_attn=True):
    """query/key/value: [B, H, S, D]; mask: [B*H, 1, S] bool/int or None.

    Returns (output [B*H, S, D], attn [B*H, S, S]) if return_attn else output.
    """
    B, H, S, D = query.shape
    BH = B * H
    q = query.reshape(BH, S, D)
    k = key.reshape(BH, S, D)
    v = value.reshape(BH, S, D)

    # Hoisted mask -> additive bias (computed once, not per q-tile in-kernel).
    if mask is None:
        bias = jnp.zeros((BH, 1, S), dtype=jnp.float32)
    else:
        bias = jnp.where(mask.reshape(BH, 1, S) != 0,
                         jnp.float32(-1e30), jnp.float32(0.0))

    tq = _pick_q_tile(S)
    pad_q = (-S) % tq
    s_q = S + pad_q
    if pad_q:
        q = jnp.pad(q, ((0, 0), (0, pad_q), (0, 0)))
    n_q_tiles = s_q // tq

    kernel = functools.partial(_sdpa_kernel,
                               inv_temperature=1.0 / float(temperature))

    in_specs = [
        pl.BlockSpec((1, tq, D), lambda b, qi: (b, qi, 0)),   # q (tiled)
        pl.BlockSpec((1, S, D), lambda b, qi: (b, 0, 0)),     # k (resident)
        pl.BlockSpec((1, S, D), lambda b, qi: (b, 0, 0)),     # v (resident)
        pl.BlockSpec((1, 1, S), lambda b, qi: (b, 0, 0)),     # bias (resident)
    ]
    if return_attn:
        out_specs = (
            pl.BlockSpec((1, tq, D), lambda b, qi: (b, qi, 0)),   # output
            pl.BlockSpec((1, tq, S), lambda b, qi: (b, qi, 0)),   # attn
        )
        out_shape = (
            jax.ShapeDtypeStruct((BH, s_q, D), query.dtype),
            jax.ShapeDtypeStruct((BH, s_q, S), query.dtype),
        )
    else:
        out_specs = pl.BlockSpec((1, tq, D), lambda b, qi: (b, qi, 0))
        out_shape = jax.ShapeDtypeStruct((BH, s_q, D), query.dtype)

    grid_spec = pltpu.PrefetchScalarGridSpec(
        num_scalar_prefetch=0,
        grid=(BH, n_q_tiles),
        in_specs=in_specs,
        out_specs=out_specs,
    )

    result = pl.pallas_call(
        kernel,
        out_shape=out_shape,
        grid_spec=grid_spec,
        compiler_params=pltpu.CompilerParams(
            # Both axes are independent (no accumulator across q-tiles), so
            # mark both parallel: small-BH cases still fill both v7x cores.
            # K/V index_maps are constant in qi, so within a core they stay
            # resident in VMEM across consecutive q-tiles (no re-DMA).
            dimension_semantics=("parallel", "parallel"),
            vmem_limit_bytes=_vmem_limit_bytes(tq, S, D, query.dtype,
                                               return_attn),
        ),
    )(q, k, v, bias)

    if return_attn:
        out, attn = result
        if pad_q:
            out = out[:, :S, :]
            attn = attn[:, :S, :]
        return out, attn
    out = result
    if pad_q:
        out = out[:, :S, :]
    return out


def _reference(query, key, value, mask, temperature):
    B, H, S, D = query.shape
    q = query.reshape(B * H, S, D).astype(jnp.float32)
    k = key.reshape(B * H, S, D).astype(jnp.float32)
    v = value.reshape(B * H, S, D).astype(jnp.float32)
    attn = jnp.einsum("bqd,bkd->bqk", q, k) / temperature
    if mask is not None:
        attn = jnp.where(mask.reshape(B * H, 1, S), -jnp.inf, attn)
    attn = jax.nn.softmax(attn, axis=-1)
    out = jnp.einsum("bqk,bkd->bqd", attn, v)
    return out, attn


if __name__ == "__main__":
    batch, heads, seq, head_dim = 2, 2, 8, 32
    temperature = float(head_dim) ** 0.5

    key0 = jax.random.PRNGKey(0)
    kq, kk, kv = jax.random.split(key0, 3)
    query = jax.random.normal(kq, (batch, heads, seq, head_dim), dtype=jnp.float32)
    key_t = jax.random.normal(kk, (batch, heads, seq, head_dim), dtype=jnp.float32)
    value = jax.random.normal(kv, (batch, heads, seq, head_dim), dtype=jnp.float32)

    # Deterministic padding mask: mask out the last 2 key positions for half
    # the (batch*head) rows, nothing for the rest.
    BH = batch * heads
    pos = jnp.arange(seq)[None, None, :]                     # (1, 1, S)
    lens = jnp.where(jnp.arange(BH) % 2 == 0, seq, seq - 2)  # (BH,)
    mask = pos >= lens[:, None, None]                        # (BH, 1, S) bool

    out, attn = scaled_dot_product_attention(
        query, key_t, value, mask, temperature=temperature
    )
    out = jax.block_until_ready(out)
    attn = jax.block_until_ready(attn)

    ref_out, ref_attn = _reference(query, key_t, value, mask, temperature)
    assert jnp.allclose(out, ref_out, atol=1e-4, rtol=1e-4)
    assert jnp.allclose(attn, ref_attn, atol=1e-4, rtol=1e-4)
    assert out.shape == (BH, seq, head_dim)
    assert attn.shape == (BH, seq, seq)

    # mask=None path
    out2, attn2 = scaled_dot_product_attention(
        query, key_t, value, None, temperature=temperature
    )
    out2 = jax.block_until_ready(out2)
    ref_out2, ref_attn2 = _reference(query, key_t, value, None, temperature)
    assert jnp.allclose(out2, ref_out2, atol=1e-4, rtol=1e-4)
    assert jnp.allclose(attn2, ref_attn2, atol=1e-4, rtol=1e-4)

    # flash-style path that skips the S*S attention writeback entirely
    out3 = scaled_dot_product_attention(
        query, key_t, value, mask, temperature=temperature, return_attn=False
    )
    out3 = jax.block_until_ready(out3)
    assert jnp.allclose(out3, ref_out, atol=1e-4, rtol=1e-4)

    print("KERNEL_OK")
</pallas_src>

<mosaic_0001>
module attributes {stable_mosaic.version = 11 : i64} {
  func.func @_sdpa_kernel(%arg0: i32, %arg1: i32, %arg2: memref<1x8x32xf32, #tpu.memory_space<vmem>>, %arg3: memref<1x8x32xf32, #tpu.memory_space<vmem>>, %arg4: memref<1x8x32xf32, #tpu.memory_space<vmem>>, %arg5: memref<1x1x8xf32, #tpu.memory_space<vmem>>, %arg6: memref<1x8x32xf32, #tpu.memory_space<vmem>>, %arg7: memref<1x8x8xf32, #tpu.memory_space<vmem>>) attributes {dimension_semantics = [#tpu.dimension_semantics<parallel>, #tpu.dimension_semantics<parallel>], iteration_bounds = array<i64: 4, 1>, scalar_prefetch = 0 : i64, scratch_operands = 0 : i64, tpu.core_type = #tpu.core_type<tc>, window_params = [{transform_indices = @transform_0, window_bounds = array<i64: 1, 8, 32>}, {transform_indices = @transform_1, window_bounds = array<i64: 1, 8, 32>}, {transform_indices = @transform_2, window_bounds = array<i64: 1, 8, 32>}, {transform_indices = @transform_3, window_bounds = array<i64: 1, 1, 8>}, {transform_indices = @transform_4, window_bounds = array<i64: 1, 8, 32>}, {transform_indices = @transform_5, window_bounds = array<i64: 1, 8, 8>}]} {
    %c0 = arith.constant 0 : index
    %c0_0 = arith.constant 0 : index
    %c0_1 = arith.constant 0 : index
    %0 = vector.load %arg2[%c0, %c0_0, %c0_1] : memref<1x8x32xf32, #tpu.memory_space<vmem>>, vector<1x8x32xf32>
    %1 = vector.shape_cast %0 : vector<1x8x32xf32> to vector<8x32xf32>
    %cst = arith.constant 0.176776692 : f32
    %2 = vector.broadcast %cst : f32 to vector<8x32xf32>
    %3 = arith.mulf %1, %2 : vector<8x32xf32>
    %c0_2 = arith.constant 0 : index
    %c0_3 = arith.constant 0 : index
    %c0_4 = arith.constant 0 : index
    %4 = vector.load %arg3[%c0_2, %c0_3, %c0_4] : memref<1x8x32xf32, #tpu.memory_space<vmem>>, vector<1x8x32xf32>
    %5 = vector.shape_cast %4 : vector<1x8x32xf32> to vector<8x32xf32>
    %c0_5 = arith.constant 0 : index
    %c0_6 = arith.constant 0 : index
    %c0_7 = arith.constant 0 : index
    %6 = vector.load %arg4[%c0_5, %c0_6, %c0_7] : memref<1x8x32xf32, #tpu.memory_space<vmem>>, vector<1x8x32xf32>
    %7 = vector.shape_cast %6 : vector<1x8x32xf32> to vector<8x32xf32>
    %c0_8 = arith.constant 0 : index
    %c0_9 = arith.constant 0 : index
    %c0_10 = arith.constant 0 : index
    %8 = vector.load %arg5[%c0_8, %c0_9, %c0_10] : memref<1x1x8xf32, #tpu.memory_space<vmem>>, vector<1x1x8xf32>
    %9 = vector.shape_cast %8 : vector<1x1x8xf32> to vector<1x8xf32>
    %cst_11 = arith.constant dense<0.000000e+00> : vector<8x8xf32>
    %10 = tpu.matmul %3, %5, %cst_11 {dimension_numbers = #tpu.dot_dimension_numbers<[1], [1], [0], [0], [0, 0, 1, 0], [], []>} : vector<8x32xf32>, vector<8x32xf32>, vector<8x8xf32> -> vector<8x8xf32>
    %11 = vector.broadcast %9 : vector<1x8xf32> to vector<8x8xf32>
    %12 = arith.addf %10, %11 : vector<8x8xf32>
    %cst_12 = arith.constant dense<0xFF800000> : vector<8xf32>
    %13 = vector.multi_reduction <maximumf>, %12, %cst_12 [1] : vector<8x8xf32> to vector<8xf32>
    %14 = vector.shape_cast %13 : vector<8xf32> to vector<8x1xf32>
    %15 = vector.broadcast %14 : vector<8x1xf32> to vector<8x8xf32>
    %16 = arith.subf %12, %15 : vector<8x8xf32>
    %17 = math.exp %16 : vector<8x8xf32>
    %cst_13 = arith.constant dense<0.000000e+00> : vector<8xf32>
    %18 = vector.multi_reduction <add>, %17, %cst_13 [1] : vector<8x8xf32> to vector<8xf32>
    %19 = vector.shape_cast %18 : vector<8xf32> to vector<8x1xf32>
    %cst_14 = arith.constant 1.000000e+00 : f32
    %20 = vector.broadcast %cst_14 : f32 to vector<8x1xf32>
    %21 = arith.divf %20, %19 : vector<8x1xf32>
    %22 = vector.broadcast %21 : vector<8x1xf32> to vector<8x8xf32>
    %23 = arith.mulf %17, %22 : vector<8x8xf32>
    %c0_15 = arith.constant 0 : index
    %c0_16 = arith.constant 0 : index
    %c0_17 = arith.constant 0 : index
    %24 = vector.load %arg7[%c0_15, %c0_16, %c0_17] : memref<1x8x8xf32, #tpu.memory_space<vmem>>, vector<1x8x8xf32>
    %25 = vector.shape_cast %24 : vector<1x8x8xf32> to vector<8x8xf32>
    %26 = vector.shape_cast %23 : vector<8x8xf32> to vector<1x8x8xf32>
    tpu.vector_store %arg7[%c0_15, %c0_16, %c0_17], %26 {strides = array<i32>} : memref<1x8x8xf32, #tpu.memory_space<vmem>>, vector<1x8x8xf32>,
    %cst_18 = arith.constant dense<0.000000e+00> : vector<8x32xf32>
    %27 = tpu.matmul %23, %7, %cst_18 {dimension_numbers = #tpu.dot_dimension_numbers<[1], [0], [0], [1], [0, 0, 1, 1], [], []>} : vector<8x8xf32>, vector<8x32xf32>, vector<8x32xf32> -> vector<8x32xf32>
    %c0_19 = arith.constant 0 : index
    %c0_20 = arith.constant 0 : index
    %c0_21 = arith.constant 0 : index
    %28 = vector.load %arg6[%c0_19, %c0_20, %c0_21] : memref<1x8x32xf32, #tpu.memory_space<vmem>>, vector<1x8x32xf32>
    %29 = vector.shape_cast %28 : vector<1x8x32xf32> to vector<8x32xf32>
    %30 = vector.shape_cast %27 : vector<8x32xf32> to vector<1x8x32xf32>
    tpu.vector_store %arg6[%c0_19, %c0_20, %c0_21], %30 {strides = array<i32>} : memref<1x8x32xf32, #tpu.memory_space<vmem>>, vector<1x8x32xf32>,
    return
  }
  func.func @transform_0(%arg0: i32, %arg1: i32) -> (i32, i32, i32) {
    %c0_i32 = arith.constant 0 : i32
    %c0_i32_0 = arith.constant 0 : i32
    return %arg0, %arg1, %c0_i32 : i32, i32, i32
  }
  func.func @transform_1(%arg0: i32, %arg1: i32) -> (i32, i32, i32) {
    %c0_i32 = arith.constant 0 : i32
    %c0_i32_0 = arith.constant 0 : i32
    %c0_i32_1 = arith.constant 0 : i32
    return %arg0, %c0_i32, %c0_i32_0 : i32, i32, i32
  }
  func.func @transform_2(%arg0: i32, %arg1: i32) -> (i32, i32, i32) {
    %c0_i32 = arith.constant 0 : i32
    %c0_i32_0 = arith.constant 0 : i32
    %c0_i32_1 = arith.constant 0 : i32
    return %arg0, %c0_i32, %c0_i32_0 : i32, i32, i32
  }
  func.func @transform_3(%arg0: i32, %arg1: i32) -> (i32, i32, i32) {
    %c0_i32 = arith.constant 0 : i32
    %c0_i32_0 = arith.constant 0 : i32
    %c0_i32_1 = arith.constant 0 : i32
    return %arg0, %c0_i32, %c0_i32_0 : i32, i32, i32
  }
  func.func @transform_4(%arg0: i32, %arg1: i32) -> (i32, i32, i32) {
    %c0_i32 = arith.constant 0 : i32
    %c0_i32_0 = arith.constant 0 : i32
    return %arg0, %arg1, %c0_i32 : i32, i32, i32
  }
  func.func @transform_5(%arg0: i32, %arg1: i32) -> (i32, i32, i32) {
    %c0_i32 = arith.constant 0 : i32
    %c0_i32_0 = arith.constant 0 : i32
    return %arg0, %arg1, %c0_i32 : i32, i32, i32
  }
}

</mosaic_0001>

<bundles_post_ra>
// kernel: tpu_custom_call.1
= control target key start
LH: loop header
LB: loop body
LE: loop exit
PB: predicated region body
PF: predicated region fallthrough
CT: control target
= control target key end

     0   :  { %s1402_s0 = inlined_call_operand.hbm [shape: f32[4,8,32], index: 0, kind: input, shape index: {}]   ;;  %s1403_s1 = inlined_call_operand.hbm [shape: f32[4,8,32], index: 1, kind: input, shape index: {}]   ;;  %s1404_s2 = inlined_call_operand.hbm [shape: f32[4,8,32], index: 2, kind: input, shape index: {}]   ;;  %s1405_s3 = inlined_call_operand.vmem [shape: f32[4,1,8], index: 3, kind: input, shape index: {}]   ;;  %s1406_s4 = inlined_call_operand.hbm [shape: f32[4,8,32], index: 4, kind: output, shape index: {0}]   ;;  %s1407_s5 = inlined_call_operand.hbm [shape: f32[4,8,8], index: 5, kind: output, shape index: {1}]  }
   0x1   :  { %1416 = sst [smem:[#allocation20_spill]] %s1403_s1 }
   0x2   :  { %11 = vsyncpa [#allocation3], 0 }
   0x3   :  { %13 = vsyncpa [#allocation3 + $0x1], 0 }
   0x4   :  { %14 = vsyncpa [#allocation6], 0 }
   0x5   :  { %16 = vsyncpa [#allocation6 + $0x1], 0 }
   0x6   :  { %17 = vsyncpa [#allocation4], 0 }
   0x7   :  { %19 = vsyncpa [#allocation4 + $0x1], 0 }
   0x8   :  { %20 = vsyncpa [#allocation10], 0 }
   0x9   :  { %22 = vsyncpa [#allocation10 + $0x1], 0  ;;  %s1100_s18 = smov 0   ;;  %s1102_s19 = smov 0  }
   0xa   :  { %s1104_s20 = smov 0   ;;  %s1106_s21 = smov 0  }
   0xb   :  { %s1108_s22 = smov 0   ;;  %s1110_s23 = smov 0  }
   0xc LB: > { %1417 = sst [smem:[#allocation15_spill]] %s1041_s18  ;;  %s1131_s24 = sadd.s32 4294967295, %s1061_s23   ;;  %s1061_s23 = sphi %s1110_s23, %s28_s23   ;;  %s1057_s22 = sphi %s1108_s22, %s1442_s22   ;;  %s1053_s21 = sphi %s1106_s21, %s1441_s21   ;;  %s1049_s20 = sphi %s1104_s20, %s1445_s20   ;;  %s1045_s19 = sphi %s1102_s19, %s1444_s19   ;;  %s1041_s18 = sphi %s1100_s18, %s1443_s18  }
   0xd   : > { %1418 = sst [smem:[#allocation16_spill]] %s1057_s22  ;;  %s731_s25 = sadd.s32 4294967294, %s1061_s23  }
   0xe   : > { %s40_s26 = sadd.s32 1, %s1057_s22  ;;  %s49_s27 = sadd.s32 1, %s1049_s20 }
   0xf   : > { %p42_p0 = scmp.ge.s32.totalorder %s40_s26, 4  ;;  %p56_p1 = scmp.ne.s32.totalorder %s1049_s20, %s1045_s19 }
  0x10   : > { %p57_p2 = scmp.eq.s32.totalorder %s1061_s23, 0  ;;  %p62_p3 = scmp.ne.s32.totalorder %s1045_s19, %s1041_s18 }
  0x11   : > { %s1447_s26 = smov (%p42_p0, %s40_s26), 0  ;;  %p63_p5 = scmp.eq.s32.totalorder %s1131_s24, 0 }
  0x12   : > { %1419 = sst [smem:[#allocation17_spill]] %s1447_s26  ;;  %p1143_p4 = por %p57_p2, %p56_p1 }
  0x13   : > { %s44_s29 = ssub.s32 %s1057_s22, %s1447_s26  ;;  %p166_p6 = scmp.eq.s32.totalorder %s1131_s24, 3 }
  0x14   : > { %p47_p7 = scmp.eq.s32.totalorder %s44_s29, 0  ;;  %p1151_p8 = por %p63_p5, %p62_p3 }
  0x15   : > { %p1155_p9 = por %p166_p6, %p56_p1  ;;  %p172_p10 = scmp.eq.s32.totalorder %s731_s25, 3 }
  0x16   : > { %s1421_s30 = scalar_select %p1151_p8, 1, 0 }
  0x17   : > { %s1422_s6 = scalar_select %p1155_p9, 1, 0 }
  0x18   : > { %s1160_s7 = scalar_select %p47_p7, %s1049_s20, %s49_s27  }
  0x19   : > { %p1162_p11 = por %p172_p10, %p62_p3  ;;  %p797_p12 = scmp.lt.s32.totalorder %s1061_s23, 4 }
  0x1a   : > { %1423 = sst [smem:[#allocation18_spill]] %s1160_s7  ;;  %s1408_s9 = sand.u32 1, %s1049_s20  }
  0x1b   : > { %s1424_s8 = scalar_select %p1162_p11, 1, 0 }
  0x1c   : > { %s1170_s10 = sshll.u32 %s1408_s9, 3  ;;  %s1173_s11 = sshll.u32 %s1057_s22, 7 }
  0x1d   : > { %1425 = sst [smem:[#allocation19_spill]] %s1424_s8  ;;  %p1177_p13 = pnand %p797_p12, %p1143_p4 }
  0x1e   : > { %s239_s13 = sand.u32 1, %s1061_s23   ;;  %s1427_s1 = sld [smem:[#allocation20_spill]] }
  0x1f   : > { %s1426_s12 = scalar_select %p1177_p13, 1, 0 }
  0x20   : > { %s243_s17 = scalar_lea.vmem [#allocation5], %s1170_s10  ;;  %s1193_s27 = scalar_lea.sflag [#allocation6], %s239_s13 }
  0x21   : > { %s250_s25 = sshll.u32 %s243_s17, 4  ;;  %p1199_p3 = pneg %p1177_p13  ;;  %s1190_s25 = int_to_ptr.vmem [resolvable:$true] %s250_s25 }
  0x24   : > { %s1186_s16 = scalar_lea.hbm %s1427_s1, %s1173_s11  ;;  %s858_s17 = scalar_lea.hbm %s1427_s1, 512 }
  0x25   : > { %s853_s28 = scalar_lea.hbm %s1186_s16, 128  ;;  %p859_p6 = scmp.lt.u32.totalorder %s1186_s16, %s1427_s1 }
  0x26   : > { %p854_p2 = scmp.ne.s32.totalorder %s1186_s16, %s853_s28  ;;  %p860_p7 = scmp.lt.u32.totalorder %s858_s17, %s853_s28 }
  0x27   : > { %p862_p12 = scmp.lt.u32.totalorder %s853_s28, %s1186_s16 }
  0x28   : > { %p856_p4 = pnand %p1199_p3, %p854_p2  ;;  %p861_p10 = por %p860_p7, %p859_p6 }
  0x2a   : > { %p857_p5 = pneg %p856_p4  ;;  %p863_p0 = por %p862_p12, %p861_p10 }
  0x2c   : > { %p864_p1 = pnand %p863_p0, %p857_p5 }
  0x2e   : > { %867 = shalt.err (!%p864_p1)
}
  0x2f   : > { %s868_s13 = scalar_lea.vmem %s1190_s25, 128  ;;  %s1063_s14 = smov [#allocation5]  }
  0x30   : > { %p869_p2 = scmp.ne.s32.totalorder %s1190_s25, %s868_s13  ;;  %s873_s15 = sshll.u32 %s1063_s14, 4  ;;  %s874_s15 = int_to_ptr.vmem [resolvable:$false] %s873_s15 }
  0x31   : > { %s875_s26 = scalar_lea.vmem %s874_s15, 256  ;;  %p876_p9 = scmp.lt.s32.totalorder %s1190_s25, %s874_s15 }
  0x32   : > { %p871_p4 = pnand %p869_p2, %p1199_p3  ;;  %p877_p8 = scmp.lt.s32.totalorder %s875_s26, %s868_s13 }
  0x34   : > { %p872_p11 = pneg %p871_p4  ;;  %p878_p6 = por %p877_p8, %p876_p9 }
  0x36   : > { %p879_p7 = pnand %p878_p6, %p872_p11 }
  0x38   : > { %882 = shalt.err (!%p879_p7)
}
  0x39   : > { %786 = dma.hbm_to_vmem [thread:$0]  (!%p1177_p13), %s1186_s16, 128, %s1190_s25, %s1193_s27  }
  0x3a   : > { %p1429_p0 = scmp.lt.s32.totalorder %s1061_s23, 5  ;;  %p1430_p1 = scmp.ge.s32.totalorder %s1061_s23, 1 }
  0x3b   : > { %s1235_s13 = scalar_lea.hbm %s1402_s0, %s1173_s11  ;;  %s224_s14 = scalar_lea.vmem [#allocation2], %s1170_s10 }
  0x3c   : > { %p1227_p5 = pnand %p1430_p1, %p1429_p0  ;;  %s232_s15 = sshll.u32 %s224_s14, 4  ;;  %s1238_s15 = int_to_ptr.vmem [resolvable:$true] %s232_s15 }
  0x3d   : > { %s1244_s26 = scalar_lea.hbm %s1404_s2, %s1173_s11  ;;  %s1432_s1 = sand.u32 1, %s1049_s20  }
  0x3e   : > { %s1431_s9 = scalar_select %p1227_p5, 1, 0 }
  0x3f   : > { %s221_s22 = scalar_lea.sflag [#allocation3], %s1432_s1  ;;  %s883_s7 = scalar_lea.hbm %s1235_s13, 128 }
  0x40   : > { %p884_p8 = scmp.ne.s32.totalorder %s1235_s13, %s883_s7  ;;  %s888_s8 = scalar_lea.hbm %s1402_s0, 512 }
  0x41   : > { %p889_p10 = scmp.lt.u32.totalorder %s1235_s13, %s1402_s0  ;;  %p890_p12 = scmp.lt.u32.totalorder %s888_s8, %s883_s7 }
  0x42   : > { %p886_p9 = pnand %p884_p8, %p1199_p3  ;;  %p892_p4 = scmp.lt.u32.totalorder %s883_s7, %s1235_s13 }
  0x43   : > { %p891_p2 = por %p890_p12, %p889_p10 }
  0x44   : > { %p887_p11 = pneg %p886_p9 }
  0x45   : > { %p893_p6 = por %p892_p4, %p891_p2 }
  0x47   : > { %p894_p7 = pnand %p893_p6, %p887_p11 }
  0x49   : > { %897 = shalt.err (!%p894_p7)
}
  0x4a   : > { %s898_s1 = scalar_lea.vmem %s1238_s15, 128  ;;  %s1064_s11 = smov [#allocation2]  }
  0x4b   : > { %p899_p0 = scmp.ne.s32.totalorder %s1238_s15, %s898_s1  ;;  %s903_s16 = sshll.u32 %s1064_s11, 4  ;;  %s904_s16 = int_to_ptr.vmem [resolvable:$false] %s903_s16 }
  0x4c   : > { %s905_s18 = scalar_lea.vmem %s904_s16, 256  ;;  %p906_p9 = scmp.lt.s32.totalorder %s1238_s15, %s904_s16 }
  0x4d   : > { %p901_p1 = pnand %p899_p0, %p1199_p3  ;;  %p907_p5 = scmp.lt.s32.totalorder %s905_s18, %s898_s1 }
  0x4f   : > { %p902_p8 = pneg %p901_p1  ;;  %p908_p10 = por %p907_p5, %p906_p9 }
  0x51   : > { %p909_p12 = pnand %p908_p10, %p902_p8 }
  0x53   : > { %912 = shalt.err (!%p909_p12)
}
  0x54   : > { %783 = dma.hbm_to_vmem [thread:$0]  (!%p1177_p13), %s1235_s13, 128, %s1238_s15, %s221_s22  }
  0x55   : > { %s261_s7 = scalar_lea.vmem [#allocation7], %s1170_s10  ;;  %s913_s25 = scalar_lea.hbm %s1244_s26, 128 }
  0x56   : > { %s268_s8 = sshll.u32 %s261_s7, 4  ;;  %p914_p11 = scmp.ne.s32.totalorder %s1244_s26, %s913_s25  ;;  %s269_s8 = int_to_ptr.vmem [resolvable:$true] %s268_s8 }
  0x57   : > { %s918_s14 = scalar_lea.hbm %s1404_s2, 512  ;;  %p919_p4 = scmp.lt.u32.totalorder %s1244_s26, %s1404_s2 }
  0x58   : > { %p916_p5 = pnand %p914_p11, %p1199_p3  ;;  %p920_p6 = scmp.lt.u32.totalorder %s918_s14, %s913_s25 }
  0x59   : > { %p922_p0 = scmp.lt.u32.totalorder %s913_s25, %s1244_s26 }
  0x5a   : > { %p917_p2 = pneg %p916_p5  ;;  %p921_p7 = por %p920_p6, %p919_p4 }
  0x5c   : > { %p923_p1 = por %p922_p0, %p921_p7 }
  0x5e   : > { %p924_p8 = pnand %p923_p1, %p917_p2 }
  0x60   : > { %927 = shalt.err (!%p924_p8)
}
  0x61   : > { %s928_s22 = scalar_lea.vmem %s269_s8, 128  ;;  %s1065_s10 = smov [#allocation7]  }
  0x62   : > { %p929_p9 = scmp.ne.s32.totalorder %s269_s8, %s928_s22  ;;  %s933_s13 = sshll.u32 %s1065_s10, 4  ;;  %s934_s13 = int_to_ptr.vmem [resolvable:$false] %s933_s13 }
  0x63   : > { %s935_s15 = scalar_lea.vmem %s934_s13, 256  ;;  %p936_p11 = scmp.lt.s32.totalorder %s269_s8, %s934_s13 }
  0x64   : > { %p931_p10 = pnand %p929_p9, %p1199_p3  ;;  %p937_p5 = scmp.lt.s32.totalorder %s935_s15, %s928_s22 }
  0x66   : > { %p932_p12 = pneg %p931_p10  ;;  %p938_p13 = por %p937_p5, %p936_p11 }
  0x68   : > { %p939_p4 = pnand %p938_p13, %p932_p12 }
  0x6a   : > { %942 = shalt.err (!%p939_p4)
}
  0x6b   : > { %p1433_p6 = scmp.ne.s32.totalorder %s1426_s12, 0  ;;  %p1434_p2 = scmp.ne.s32.totalorder %s1431_s9, 0 }
  0x6c   : > { %s1291_s29 = sand.u32 (!%p1434_p2), 1, %s1045_s19   ;;  %p1435_p13 = scmp.ne.s32.totalorder (!%p1434_p2), %s1421_s30, 0 }
  0x6d   : > { %789 = dma.hbm_to_vmem [thread:$0]  (!%p1433_p6), %s1244_s26, 128, %s269_s8, %s1193_s27  }
  0x6e   : > { %283 = sbr.rel (%p1434_p2) target bundleno = 881 (0x371), region = 36  ;;  %s1294_s16 = sshll.u32 (!%p1434_p2), %s1291_s29, 3 }
  0x6f   : > { %s286_s18 = scalar_lea.sflag (!%p1434_p2), [#allocation3], %s1291_s29  ;;  %s289_s7 = scalar_lea.vmem (!%p1434_p2), [#allocation2], %s1294_s16 }
  0x75   : > { %1024 = dma.done.wait (%p1435_p13), %s286_s18, 128  }
  0x76   : > { %1026 = vsyncadd (%p1435_p13), %s286_s18, 4294967168  ;;  %s294_s12 = sand.u32 1, %s1131_s24   ;;  %s298_s9 = scalar_lea.vmem [#allocation5], %s1294_s16 }
  0x77   : > { %s295_s27 = scalar_lea.sflag [#allocation6], %s294_s12 }
  0x78   : > { %1028 = dma.done.wait (%p1435_p13), %s295_s27, 256  }
  0x79   : > { %1030 = vsyncadd (%p1435_p13), %s295_s27, 4294967040  ;;  %v1066_v0 = vmov 0.0   ;;  %vm1067_vm0 = vmmov 0   ;;  %vm366_vm1 = vcmask 261120   ;;  %v357_v1 = vld [vmem:[%s298_s9] sm:$0xff]  ;;  %v355_v2 = vld [vmem:[%s289_s7] sm:$0xff] }
  0x7a   : > { %760 = vmatprep.subr.mxu0 %v1066_v0  ;;  %762 = vmatprep.mubr.msk.f32.mxu0 %vm1067_vm0, %v1066_v0  ;;  %v356_v3 = vmul.f32 0.17677669, %v355_v2  ;;  %p352_p3 = scmp.lt.s32.totalorder %s1053_s21, 3  ;;  %vm443_vm2 = vcmask 64512   ;;  %s307_s25 = scalar_lea.vmem [#allocation7], %s1294_s16 }
  0x7b   : > { %765 = vmatprep.subr.mxu1 %v1066_v0  ;;  %767 = vmatprep.mubr.msk.f32.mxu1 %vm1067_vm0, %v1066_v0  ;;  %v358_v14 = vld [vmem:[%s307_s25] sm:$0xff]  ;;  %s351_s28 = scalar_lea.vmem [#allocation9], %s1294_s16  ;;  %s752_s17 = sshll.u32 %s1053_s21, 7 }
  0x7c   : > { %761 = vmatpush3.xpose.msk.msra.mxu0 %vm366_vm1, %v357_v1  ;;  %s353_s24 = scalar_select %p352_p3, %s1053_s21, 3  ;;  %766 = vmatpush3.msra.mxu1 %v358_v14 }
  0x7d   : > { %s1327_s11 = scalar_lea.hbm %s1407_s5, %s752_s17  ;;  %s565_s22 = sshll.u32 %s351_s28, 4  ;;  %s566_s22 = int_to_ptr.vmem [resolvable:$true] %s565_s22 }
  0x7e   : > { %s354_s8 = scalar_lea.vmem %s1405_s3, %s353_s24  ;;  %s537_s10 = scalar_lea.sflag [#allocation10], %s1291_s29 }
  0x7f   : > { %763 = vmatmul.mubr.msk.f32.vlgmr.msra.gmra.mrb[0].mxu0 %vm366_vm1, %v356_v3  ;;  %v746_v4 = vld [vmem:[%s354_s8] ss:$0 sm:$0xff]  ;;  %s943_s13 = scalar_lea.vmem %s566_s22, 128  ;;  %p1436_p0 = scmp.ne.s32.totalorder %s1422_s6, 0 }
  0x80   : > { %p944_p7 = scmp.ne.s32.totalorder %s566_s22, %s943_s13  ;;  %s1068_s15 = smov [#allocation9]  }
  0x81   : > { %s947_s18 = sshll.u32 %s1068_s15, 4  ;;  %s948_s18 = int_to_ptr.vmem [resolvable:$false] %s947_s18 }
  0x82   : > { %p945_p1 = pnand %p944_p7, %p1436_p0  ;;  %s949_s7 = scalar_lea.vmem %s948_s18, 256 }
  0x83   : > { %p950_p9 = scmp.lt.s32.totalorder %s566_s22, %s948_s18  ;;  %p951_p10 = scmp.lt.s32.totalorder %s949_s7, %s943_s13 }
  0x84   : > { %p946_p8 = pneg %p945_p1 }
  0x85   : > { %p952_p12 = por %p951_p10, %p950_p9 }
  0x87   : > { %p953_p11 = pnand %p952_p12, %p946_p8 }
 0x152   : > { %v439_v5 = vpop.f32.mrb[0].mxu0 }
 0x153   : > { %v440_v6 = vadd.f32 %v746_v4, %v439_v5  ;;  %v764_v7 = vpop.f32.mrb[1].mxu0 }
 0x155   : > { %v444_v8 = vsel %vm443_vm2, %v440_v6, -inf }
 0x156   : > { %445 = vmax.xlane.f32.xlu0 %v444_v8 }
 0x1e3   : > { %v446_v9 = vpop.xlane.xlu0 %445 }
 0x1e4   : > { %v447_v10 = vsub.f32 %v440_v6, %v446_v9 }
 0x1e6   : > { %v448_v11 = vmul.f32 1.442695, %v447_v10 }
 0x1e8   : > { %849 = vpow2.f32 %v448_v11 }
 0x1f2   : > { %v850_v12 = vpop.eup %849 }
 0x1f3   : > { %v450_v13 = vsel %vm443_vm2, %v850_v12, 0.0 }
 0x1f4   : > { %451 = vadd.xlane.f32.xlu0 %v450_v13 }
 0x281   : > { %v452_v15 = vpop.xlane.xlu0 %451 }
 0x282   : > { %851 = vrcp.f32 %v452_v15 }
 0x28c   : > { %v852_v16 = vpop.eup %851 }
 0x28d   : > { %v455_v17 = vmul.f32 %v852_v16, %v850_v12 }
 0x28f   : > { %768 = vmatmul.mubr.msk.f32.vlgmr.msra.gmra.mrb[0].mxu1 %vm443_vm2, %v455_v17  ;;  %456 = vst.msk [vmem:[%s351_s28] sm:$0xff] %vm443_vm2, %v455_v17 }
 0x290   : > { %956 = shalt.err (!%p953_p11)
}
 0x291   : > { %s957_s12 = scalar_lea.hbm %s1327_s11, 128  ;;  %s961_s24 = scalar_lea.hbm %s1407_s5, 512 }
 0x292   : > { %p958_p5 = scmp.ne.s32.totalorder %s1327_s11, %s957_s12  ;;  %p962_p2 = scmp.lt.u32.totalorder %s1327_s11, %s1407_s5 }
 0x293   : > { %p963_p13 = scmp.lt.u32.totalorder %s961_s24, %s957_s12  ;;  %p965_p7 = scmp.lt.u32.totalorder %s957_s12, %s1327_s11 }
 0x294   : > { %p959_p4 = pnand %p958_p5, %p1436_p0 }
 0x295   : > { %p964_p3 = por %p963_p13, %p962_p2 }
 0x296   : > { %p960_p6 = pneg %p959_p4 }
 0x297   : > { %p966_p1 = por %p965_p7, %p964_p3 }
 0x299   : > { %p967_p8 = pnand %p966_p1, %p960_p6 }
 0x29b   : > { %970 = shalt.err (!%p967_p8)
}
 0x29c   : > { %777 = dma.vmem_to_hbm [thread:$0]  (%p1436_p0), %s566_s22, 128, %s1327_s11, %s537_s10  }
 0x29d   : > { %s344_s8 = scalar_lea.vmem [#allocation8], %s1294_s16  ;;  %s1353_s1 = scalar_lea.hbm %s1406_s4, %s752_s17 }
 0x29e   : > { %s551_s25 = sshll.u32 %s344_s8, 4  ;;  %s532_s13 = scalar_lea.sflag [#allocation4], %s1291_s29  ;;  %s1355_s25 = int_to_ptr.vmem [resolvable:$true] %s551_s25 }
 0x29f   : > { %s971_s15 = scalar_lea.vmem %s1355_s25, 128  ;;  %s1069_s21 = smov [#allocation8]  }
 0x2a0   : > { %p972_p9 = scmp.ne.s32.totalorder %s1355_s25, %s971_s15  ;;  %s975_s16 = sshll.u32 %s1069_s21, 4  ;;  %s976_s16 = int_to_ptr.vmem [resolvable:$false] %s975_s16 }
 0x2a1   : > { %s977_s17 = scalar_lea.vmem %s976_s16, 256  ;;  %p978_p11 = scmp.lt.s32.totalorder %s1355_s25, %s976_s16 }
 0x2a2   : > { %p973_p10 = pnand %p972_p9, %p1436_p0  ;;  %p979_p5 = scmp.lt.s32.totalorder %s977_s17, %s971_s15 }
 0x2a4   : > { %p974_p12 = pneg %p973_p10  ;;  %p980_p4 = por %p979_p5, %p978_p11 }
 0x2a6   : > { %p981_p6 = pnand %p980_p4, %p974_p12 }
 0x362   : > { %v526_v18 = vpop.f32.mrb[0].mxu1 }
 0x363   : > { %530 = vst.msk [vmem:[%s344_s8] sm:$0xff] %vm366_vm1, %v526_v18  ;;  %v769_v19 = vpop.f32.mrb[1].mxu1 }
 0x364   : > { %984 = shalt.err (!%p981_p6)
}
 0x365   : > { %s985_s29 = scalar_lea.hbm %s1353_s1, 128  ;;  %s989_s10 = scalar_lea.hbm %s1406_s4, 512 }
 0x366   : > { %p986_p2 = scmp.ne.s32.totalorder %s1353_s1, %s985_s29  ;;  %p990_p7 = scmp.lt.u32.totalorder %s1353_s1, %s1406_s4 }
 0x367   : > { %p991_p1 = scmp.lt.u32.totalorder %s989_s10, %s985_s29  ;;  %p993_p9 = scmp.lt.u32.totalorder %s985_s29, %s1353_s1 }
 0x368   : > { %p987_p13 = pnand %p986_p2, %p1436_p0 }
 0x369   : > { %p992_p8 = por %p991_p1, %p990_p7 }
 0x36a   : > { %p988_p3 = pneg %p987_p13 }
 0x36b   : > { %p994_p10 = por %p993_p9, %p992_p8 }
 0x36d   : > { %p995_p12 = pnand %p994_p10, %p988_p3 }
 0x36f   : > { %998 = shalt.err (!%p995_p12)
}
 0x370   : > { %776 = dma.vmem_to_hbm [thread:$0]  (%p1436_p0), %s1355_s25, 128, %s1353_s1, %s532_s13  }
 0x371 PF: > { %s1437_s12 = sld [smem:[#allocation15_spill]]  ;;  %s1438_s27 = sld [smem:[#allocation19_spill]] }
 0x372   : > { %p798_p11 = scmp.ge.s32.totalorder %s1061_s23, 2 }
 0x377   : > { %s577_s9 = sand.u32 1, %s1437_s12   ;;  %p1439_p5 = scmp.ne.s32.totalorder %s1438_s27, 0 }
 0x378   : > { %s578_s24 = scalar_lea.sflag [#allocation4], %s577_s9 }
 0x379   : > { %p791_p4 = pnand %p798_p11, %p1439_p5 }
 0x37b   : > { %1032 = dma.done.wait (!%p791_p4), %s578_s24, 128  }
 0x37c   : > { %1034 = vsyncadd (!%p791_p4), %s578_s24, 4294967168  ;;  %s587_s30 = scalar_lea.sflag [#allocation10], %s577_s9 }
 0x37d   : > { %1036 = dma.done.wait (!%p791_p4), %s587_s30, 128  }
 0x37e   : > { %1038 = vsyncadd (!%p791_p4), %s587_s30, 4294967168  ;;  %s28_s23 = sadd.s32 1, %s1061_s23   ;;  %s1440_s6 = sld [smem:[#allocation18_spill]] }
 0x37f   : > { %p25_p6 = scmp.ge.s32.totalorder %s28_s23, 6   ;;  %s1441_s21 = sld [smem:[#allocation16_spill]] }
 0x380   : > { %s1442_s22 = sld [smem:[#allocation17_spill]]  ;;  %s1443_s18 = smov %s1045_s19 }
 0x381   : > { %s1444_s19 = smov %s1049_s20  ;;  %27 = sbr.rel (!%p25_p6) target bundleno = 12 (0xc), region = 125 }
 0x384   : > { %s1445_s20 = smov %s1440_s6 }
 0x388   :  { %592 = vsyncpa [#allocation3], 1 }
 0x389   :  { %594 = vsyncpa [#allocation3 + $0x1], 1 }
 0x38a   :  { %595 = vsyncpa [#allocation6], 1 }
 0x38b   :  { %597 = vsyncpa [#allocation6 + $0x1], 1 }
 0x38c   :  { %598 = vsyncpa [#allocation4], 1 }
 0x38d   :  { %600 = vsyncpa [#allocation4 + $0x1], 1 }
 0x38e   :  { %601 = vsyncpa [#allocation10], 1 }
 0x38f   :  { %603 = vsyncpa [#allocation10 + $0x1], 1 }

</bundles_post_ra>
